<compile_context>
chip_gen: v5e
topology: v5e:2x2
jax: 0.10.0
libtpu: 0.0.40
codegen_flags: <defaults>
</compile_context>

<pallas_src>
import jax
import jax.numpy as jnp
from jax.experimental import pallas as pl
from jax.experimental.pallas import tpu as pltpu


# ----------------------------- Pallas kernel --------------------------------

def _full_spec(shape):
    # One block == the whole array, resident in VMEM (everything here is tiny).
    return pl.BlockSpec(shape, lambda: (0,) * len(shape))


def _decoder_step_kernel(tok_ref, emb_ref, h0_ref, c0_ref, *args):
    """Fused decoder step: embedding gather + n_layers LSTM cells + fc_out.

    tok_ref : (B,) int32   token ids (SMEM)
    emb_ref : (V, E)       embedding table (VMEM)
    h0_ref  : (L, B, H)    previous hidden states
    c0_ref  : (L, B, H)    previous cell states
    args    : w_0, b_0, ..., w_{L-1}, b_{L-1}, fc_w, fc_b      (inputs)
              logits_ref, h_out_ref, c_out_ref                 (outputs)

    w_l : (In_l + H, 4H)   fused [W_ih ; W_hh] (transposed vs PyTorch), gates i,f,g,o
    b_l : (1, 4H)          b_ih + b_hh
    """
    n_layers, B, H = h0_ref.shape

    lstm_refs = args[:2 * n_layers]
    fc_w_ref = args[2 * n_layers]
    fc_b_ref = args[2 * n_layers + 1]
    logits_ref = args[2 * n_layers + 2]
    h_out_ref = args[2 * n_layers + 3]
    c_out_ref = args[2 * n_layers + 4]

    # Embedding lookup inside the kernel: token ids are SMEM scalars, each row is
    # a dynamic sublane slice of the VMEM table. Dropout is identity in eval.
    # TODO(synk): training-mode dropout (embedding + inter-layer LSTM dropout)
    #             is not emulated (inference semantics only).
    rows = [emb_ref[pl.ds(tok_ref[b], 1), :] for b in range(B)]
    x = jnp.concatenate(rows, axis=0)                        # (B, E)

    for l in range(n_layers):
        w_ref = lstm_refs[2 * l]
        b_ref = lstm_refs[2 * l + 1]
        h_prev = h0_ref[l, :, :]                             # (B, H)
        c_prev = c0_ref[l, :, :]                             # (B, H)

        # Single fused MXU matmul per layer on [x ‖ h].
        xh = jnp.concatenate([x, h_prev], axis=-1)           # (B, In+H)
        gates = (jnp.dot(xh, w_ref[...], preferred_element_type=jnp.float32)
                 + b_ref[...])                               # (B, 4H)

        i_g = jax.nn.sigmoid(gates[:, 0 * H:1 * H])
        f_g = jax.nn.sigmoid(gates[:, 1 * H:2 * H])
        g_g = jnp.tanh(gates[:, 2 * H:3 * H])
        o_g = jax.nn.sigmoid(gates[:, 3 * H:4 * H])

        c_new = f_g * c_prev + i_g * g_g
        h_new = o_g * jnp.tanh(c_new)

        h_out_ref[l, :, :] = h_new.astype(h_out_ref.dtype)
        c_out_ref[l, :, :] = c_new.astype(c_out_ref.dtype)
        x = h_new                                            # input to next layer

    # fc_out on the last layer's hidden state.
    # TODO(synk): at production vocab sizes, tile fc_w over V with a 'parallel'
    #             grid axis instead of a full-array VMEM block.
    logits_ref[...] = (jnp.dot(x, fc_w_ref[...], preferred_element_type=jnp.float32)
                       + fc_b_ref[...]).astype(logits_ref.dtype)


# ------------------------------ Decoder glue --------------------------------

def init_decoder_params(key, vocab_size, emb_dim, hidden_dim, n_layers):
    """Deterministic synthetic parameters (same shapes as the nn.Module)."""
    params = {}
    k = key
    k, sub = jax.random.split(k)
    params["embedding"] = 0.1 * jax.random.normal(
        sub, (vocab_size, emb_dim), jnp.float32)
    for l in range(n_layers):
        in_dim = emb_dim if l == 0 else hidden_dim
        k, k1, k2, k3, k4 = jax.random.split(k, 5)
        # Stored transposed: (in, 4H) and (H, 4H); gate order i,f,g,o.
        w_ih_t = 0.1 * jax.random.normal(k1, (in_dim, 4 * hidden_dim), jnp.float32)
        w_hh_t = 0.1 * jax.random.normal(k2, (hidden_dim, 4 * hidden_dim), jnp.float32)
        # Fused weight so each layer is a single matmul on [x ‖ h].
        params[f"w_{l}"] = jnp.concatenate([w_ih_t, w_hh_t], axis=0)   # (in+H, 4H)
        b_ih = 0.1 * jax.random.normal(k3, (4 * hidden_dim,), jnp.float32)
        b_hh = 0.1 * jax.random.normal(k4, (4 * hidden_dim,), jnp.float32)
        params[f"b_{l}"] = (b_ih + b_hh).reshape(1, 4 * hidden_dim)
    k, k1, k2 = jax.random.split(k, 3)
    params["fc_w"] = 0.1 * jax.random.normal(
        k1, (hidden_dim, vocab_size), jnp.float32)           # transposed vs PyTorch
    params["fc_b"] = 0.1 * jax.random.normal(
        k2, (1, vocab_size), jnp.float32)
    return params


def decoder_forward(params, x_tokens, hiddens, n_layers):
    """x_tokens: (B,) int32 ; hiddens: (h0, c0) each (n_layers, B, H)."""
    h0, c0 = hiddens
    L, B, H = h0.shape
    assert L == n_layers
    V, E = params["embedding"].shape

    inputs = [x_tokens, params["embedding"], h0, c0]
    in_specs = [pl.BlockSpec(memory_space=pltpu.MemorySpace.SMEM),   # token ids
                _full_spec(params["embedding"].shape),
                _full_spec(h0.shape),
                _full_spec(c0.shape)]
    for l in range(n_layers):
        inputs += [params[f"w_{l}"], params[f"b_{l}"]]
        in_specs += [_full_spec(params[f"w_{l}"].shape),
                     _full_spec(params[f"b_{l}"].shape)]
    inputs += [params["fc_w"], params["fc_b"]]
    in_specs += [_full_spec(params["fc_w"].shape),
                 _full_spec(params["fc_b"].shape)]

    out_shape = (jax.ShapeDtypeStruct((B, V), jnp.float32),
                 jax.ShapeDtypeStruct((L, B, H), jnp.float32),
                 jax.ShapeDtypeStruct((L, B, H), jnp.float32))
    out_specs = (_full_spec((B, V)),
                 _full_spec((L, B, H)),
                 _full_spec((L, B, H)))

    # Advisory cost estimate for XLA scheduling.
    flops = 2 * B * H * V
    for l in range(n_layers):
        in_dim = E if l == 0 else H
        flops += 2 * B * (in_dim + H) * 4 * H
    transcendentals = n_layers * B * 5 * H
    bytes_accessed = sum(int(a.size) * a.dtype.itemsize for a in inputs)
    bytes_accessed += 4 * (B * V + 2 * L * B * H)

    # TODO(synk): for autoregressive decode, move the time loop inside the kernel
    #             (grid over T with scalar-prefetched tokens) so weights stay
    #             VMEM-resident across steps.
    logits, h_n, c_n = pl.pallas_call(
        _decoder_step_kernel,
        out_shape=out_shape,
        in_specs=in_specs,
        out_specs=out_specs,
        input_output_aliases={2: 1, 3: 2},   # h0 -> h_n, c0 -> c_n (in-place state update)
        cost_estimate=pl.CostEstimate(flops=flops,
                                      transcendentals=transcendentals,
                                      bytes_accessed=bytes_accessed),
    )(*inputs)
    return logits, (h_n, c_n)


# --------------------------------- main --------------------------------------

if __name__ == "__main__":
    VOCAB = 16
    EMB = 32
    HID = 32
    N_LAYERS = 2
    BATCH = 2

    key = jax.random.PRNGKey(0)
    kp, kx, kh, kc = jax.random.split(key, 4)

    params = init_decoder_params(kp, VOCAB, EMB, HID, N_LAYERS)

    x_tokens = jax.random.randint(kx, (BATCH,), 0, VOCAB, dtype=jnp.int32)
    h0 = 0.1 * jax.random.normal(kh, (N_LAYERS, BATCH, HID), jnp.float32)
    c0 = 0.1 * jax.random.normal(kc, (N_LAYERS, BATCH, HID), jnp.float32)

    # h0/c0 are donated so the in-place (aliased) state update avoids fresh HBM buffers.
    fwd = jax.jit(lambda p, x, h, c: decoder_forward(p, x, (h, c), N_LAYERS),
                  donate_argnums=(2, 3))
    logits, (h_n, c_n) = fwd(params, x_tokens, h0, c0)

    jax.block_until_ready((logits, h_n, c_n))

    assert logits.shape == (BATCH, VOCAB)
    assert h_n.shape == (N_LAYERS, BATCH, HID)
    assert c_n.shape == (N_LAYERS, BATCH, HID)
    print("KERNEL_OK")
</pallas_src>

<mosaic_0001>
module attributes {stable_mosaic.version = 11 : i64} {
  func.func @_decoder_step_kernel(%arg0: memref<2xi32, #tpu.memory_space<smem>>, %arg1: memref<16x32xf32, #tpu.memory_space<vmem>>, %arg2: memref<2x2x32xf32, #tpu.memory_space<vmem>>, %arg3: memref<2x2x32xf32, #tpu.memory_space<vmem>>, %arg4: memref<64x128xf32, #tpu.memory_space<vmem>>, %arg5: memref<1x128xf32, #tpu.memory_space<vmem>>, %arg6: memref<64x128xf32, #tpu.memory_space<vmem>>, %arg7: memref<1x128xf32, #tpu.memory_space<vmem>>, %arg8: memref<32x16xf32, #tpu.memory_space<vmem>>, %arg9: memref<1x16xf32, #tpu.memory_space<vmem>>, %arg10: memref<2x16xf32, #tpu.memory_space<vmem>>, %arg11: memref<2x2x32xf32, #tpu.memory_space<vmem>>, %arg12: memref<2x2x32xf32, #tpu.memory_space<vmem>>) attributes {dimension_semantics = [], scalar_prefetch = 0 : i64, scratch_operands = 0 : i64, tpu.core_type = #tpu.core_type<tc>} {
    %c0 = arith.constant 0 : index
    %0 = memref.load %arg0[%c0] : memref<2xi32, #tpu.memory_space<smem>>
    %1 = arith.index_cast %0 : i32 to index
    %c0_0 = arith.constant 0 : index
    %2 = vector.load %arg1[%1, %c0_0] : memref<16x32xf32, #tpu.memory_space<vmem>>, vector<1x32xf32>
    %c1 = arith.constant 1 : index
    %3 = memref.load %arg0[%c1] : memref<2xi32, #tpu.memory_space<smem>>
    %4 = arith.index_cast %3 : i32 to index
    %c0_1 = arith.constant 0 : index
    %5 = vector.load %arg1[%4, %c0_1] : memref<16x32xf32, #tpu.memory_space<vmem>>, vector<1x32xf32>
    %6 = tpu.concatenate %2, %5 in 0 : vector<1x32xf32>, vector<1x32xf32> -> vector<2x32xf32>
    %c0_2 = arith.constant 0 : index
    %c0_3 = arith.constant 0 : index
    %c0_4 = arith.constant 0 : index
    %7 = vector.load %arg2[%c0_2, %c0_3, %c0_4] : memref<2x2x32xf32, #tpu.memory_space<vmem>>, vector<1x2x32xf32>
    %8 = vector.shape_cast %7 : vector<1x2x32xf32> to vector<2x32xf32>
    %c0_5 = arith.constant 0 : index
    %c0_6 = arith.constant 0 : index
    %c0_7 = arith.constant 0 : index
    %9 = vector.load %arg3[%c0_5, %c0_6, %c0_7] : memref<2x2x32xf32, #tpu.memory_space<vmem>>, vector<1x2x32xf32>
    %10 = vector.shape_cast %9 : vector<1x2x32xf32> to vector<2x32xf32>
    %11 = tpu.concatenate %6, %8 in 1 : vector<2x32xf32>, vector<2x32xf32> -> vector<2x64xf32>
    %c0_8 = arith.constant 0 : index
    %c0_9 = arith.constant 0 : index
    %12 = vector.load %arg4[%c0_8, %c0_9] : memref<64x128xf32, #tpu.memory_space<vmem>>, vector<64x128xf32>
    %cst = arith.constant dense<0.000000e+00> : vector<2x128xf32>
    %13 = tpu.matmul %11, %12, %cst {dimension_numbers = #tpu.dot_dimension_numbers<[1], [0], [0], [1], [0, 0, 1, 1], [], []>} : vector<2x64xf32>, vector<64x128xf32>, vector<2x128xf32> -> vector<2x128xf32>
    %c0_10 = arith.constant 0 : index
    %c0_11 = arith.constant 0 : index
    %14 = vector.load %arg5[%c0_10, %c0_11] : memref<1x128xf32, #tpu.memory_space<vmem>>, vector<1x128xf32>
    %15 = vector.broadcast %14 : vector<1x128xf32> to vector<2x128xf32>
    %16 = arith.addf %13, %15 : vector<2x128xf32>
    %17 = vector.extract_strided_slice %16 {offsets = [0, 0], sizes = [2, 32], strides = [1, 1]} : vector<2x128xf32> to vector<2x32xf32>
    %18 = arith.negf %17 : vector<2x32xf32>
    %19 = math.exp %18 : vector<2x32xf32>
    %cst_12 = arith.constant 1.000000e+00 : f32
    %20 = vector.broadcast %cst_12 : f32 to vector<2x32xf32>
    %21 = arith.addf %20, %19 : vector<2x32xf32>
    %22 = arith.divf %20, %21 : vector<2x32xf32>
    %23 = vector.extract_strided_slice %16 {offsets = [0, 32], sizes = [2, 32], strides = [1, 1]} : vector<2x128xf32> to vector<2x32xf32>
    %24 = arith.negf %23 : vector<2x32xf32>
    %25 = math.exp %24 : vector<2x32xf32>
    %cst_13 = arith.constant 1.000000e+00 : f32
    %26 = vector.broadcast %cst_13 : f32 to vector<2x32xf32>
    %27 = arith.addf %26, %25 : vector<2x32xf32>
    %28 = arith.divf %26, %27 : vector<2x32xf32>
    %29 = vector.extract_strided_slice %16 {offsets = [0, 64], sizes = [2, 32], strides = [1, 1]} : vector<2x128xf32> to vector<2x32xf32>
    %30 = math.tanh %29 : vector<2x32xf32>
    %31 = vector.extract_strided_slice %16 {offsets = [0, 96], sizes = [2, 32], strides = [1, 1]} : vector<2x128xf32> to vector<2x32xf32>
    %32 = arith.negf %31 : vector<2x32xf32>
    %33 = math.exp %32 : vector<2x32xf32>
    %cst_14 = arith.constant 1.000000e+00 : f32
    %34 = vector.broadcast %cst_14 : f32 to vector<2x32xf32>
    %35 = arith.addf %34, %33 : vector<2x32xf32>
    %36 = arith.divf %34, %35 : vector<2x32xf32>
    %37 = arith.mulf %28, %10 : vector<2x32xf32>
    %38 = arith.mulf %22, %30 : vector<2x32xf32>
    %39 = arith.addf %37, %38 : vector<2x32xf32>
    %40 = math.tanh %39 : vector<2x32xf32>
    %41 = arith.mulf %36, %40 : vector<2x32xf32>
    %c0_15 = arith.constant 0 : index
    %c0_16 = arith.constant 0 : index
    %c0_17 = arith.constant 0 : index
    %42 = vector.load %arg11[%c0_15, %c0_16, %c0_17] : memref<2x2x32xf32, #tpu.memory_space<vmem>>, vector<1x2x32xf32>
    %43 = vector.shape_cast %42 : vector<1x2x32xf32> to vector<2x32xf32>
    %44 = vector.shape_cast %41 : vector<2x32xf32> to vector<1x2x32xf32>
    tpu.vector_store %arg11[%c0_15, %c0_16, %c0_17], %44 {strides = array<i32>} : memref<2x2x32xf32, #tpu.memory_space<vmem>>, vector<1x2x32xf32>,
    %c0_18 = arith.constant 0 : index
    %c0_19 = arith.constant 0 : index
    %c0_20 = arith.constant 0 : index
    %45 = vector.load %arg12[%c0_18, %c0_19, %c0_20] : memref<2x2x32xf32, #tpu.memory_space<vmem>>, vector<1x2x32xf32>
    %46 = vector.shape_cast %45 : vector<1x2x32xf32> to vector<2x32xf32>
    %47 = vector.shape_cast %39 : vector<2x32xf32> to vector<1x2x32xf32>
    tpu.vector_store %arg12[%c0_18, %c0_19, %c0_20], %47 {strides = array<i32>} : memref<2x2x32xf32, #tpu.memory_space<vmem>>, vector<1x2x32xf32>,
    %c1_21 = arith.constant 1 : index
    %c0_22 = arith.constant 0 : index
    %c0_23 = arith.constant 0 : index
    %48 = vector.load %arg2[%c1_21, %c0_22, %c0_23] : memref<2x2x32xf32, #tpu.memory_space<vmem>>, vector<1x2x32xf32>
    %49 = vector.shape_cast %48 : vector<1x2x32xf32> to vector<2x32xf32>
    %c1_24 = arith.constant 1 : index
    %c0_25 = arith.constant 0 : index
    %c0_26 = arith.constant 0 : index
    %50 = vector.load %arg3[%c1_24, %c0_25, %c0_26] : memref<2x2x32xf32, #tpu.memory_space<vmem>>, vector<1x2x32xf32>
    %51 = vector.shape_cast %50 : vector<1x2x32xf32> to vector<2x32xf32>
    %52 = tpu.concatenate %41, %49 in 1 : vector<2x32xf32>, vector<2x32xf32> -> vector<2x64xf32>
    %c0_27 = arith.constant 0 : index
    %c0_28 = arith.constant 0 : index
    %53 = vector.load %arg6[%c0_27, %c0_28] : memref<64x128xf32, #tpu.memory_space<vmem>>, vector<64x128xf32>
    %cst_29 = arith.constant dense<0.000000e+00> : vector<2x128xf32>
    %54 = tpu.matmul %52, %53, %cst_29 {dimension_numbers = #tpu.dot_dimension_numbers<[1], [0], [0], [1], [0, 0, 1, 1], [], []>} : vector<2x64xf32>, vector<64x128xf32>, vector<2x128xf32> -> vector<2x128xf32>
    %c0_30 = arith.constant 0 : index
    %c0_31 = arith.constant 0 : index
    %55 = vector.load %arg7[%c0_30, %c0_31] : memref<1x128xf32, #tpu.memory_space<vmem>>, vector<1x128xf32>
    %56 = vector.broadcast %55 : vector<1x128xf32> to vector<2x128xf32>
    %57 = arith.addf %54, %56 : vector<2x128xf32>
    %58 = vector.extract_strided_slice %57 {offsets = [0, 0], sizes = [2, 32], strides = [1, 1]} : vector<2x128xf32> to vector<2x32xf32>
    %59 = arith.negf %58 : vector<2x32xf32>
    %60 = math.exp %59 : vector<2x32xf32>
    %cst_32 = arith.constant 1.000000e+00 : f32
    %61 = vector.broadcast %cst_32 : f32 to vector<2x32xf32>
    %62 = arith.addf %61, %60 : vector<2x32xf32>
    %63 = arith.divf %61, %62 : vector<2x32xf32>
    %64 = vector.extract_strided_slice %57 {offsets = [0, 32], sizes = [2, 32], strides = [1, 1]} : vector<2x128xf32> to vector<2x32xf32>
    %65 = arith.negf %64 : vector<2x32xf32>
    %66 = math.exp %65 : vector<2x32xf32>
    %cst_33 = arith.constant 1.000000e+00 : f32
    %67 = vector.broadcast %cst_33 : f32 to vector<2x32xf32>
    %68 = arith.addf %67, %66 : vector<2x32xf32>
    %69 = arith.divf %67, %68 : vector<2x32xf32>
    %70 = vector.extract_strided_slice %57 {offsets = [0, 64], sizes = [2, 32], strides = [1, 1]} : vector<2x128xf32> to vector<2x32xf32>
    %71 = math.tanh %70 : vector<2x32xf32>
    %72 = vector.extract_strided_slice %57 {offsets = [0, 96], sizes = [2, 32], strides = [1, 1]} : vector<2x128xf32> to vector<2x32xf32>
    %73 = arith.negf %72 : vector<2x32xf32>
    %74 = math.exp %73 : vector<2x32xf32>
    %cst_34 = arith.constant 1.000000e+00 : f32
    %75 = vector.broadcast %cst_34 : f32 to vector<2x32xf32>
    %76 = arith.addf %75, %74 : vector<2x32xf32>
    %77 = arith.divf %75, %76 : vector<2x32xf32>
    %78 = arith.mulf %69, %51 : vector<2x32xf32>
    %79 = arith.mulf %63, %71 : vector<2x32xf32>
    %80 = arith.addf %78, %79 : vector<2x32xf32>
    %81 = math.tanh %80 : vector<2x32xf32>
    %82 = arith.mulf %77, %81 : vector<2x32xf32>
    %c1_35 = arith.constant 1 : index
    %c0_36 = arith.constant 0 : index
    %c0_37 = arith.constant 0 : index
    %83 = vector.load %arg11[%c1_35, %c0_36, %c0_37] : memref<2x2x32xf32, #tpu.memory_space<vmem>>, vector<1x2x32xf32>
    %84 = vector.shape_cast %83 : vector<1x2x32xf32> to vector<2x32xf32>
    %85 = vector.shape_cast %82 : vector<2x32xf32> to vector<1x2x32xf32>
    tpu.vector_store %arg11[%c1_35, %c0_36, %c0_37], %85 {strides = array<i32>} : memref<2x2x32xf32, #tpu.memory_space<vmem>>, vector<1x2x32xf32>,
    %c1_38 = arith.constant 1 : index
    %c0_39 = arith.constant 0 : index
    %c0_40 = arith.constant 0 : index
    %86 = vector.load %arg12[%c1_38, %c0_39, %c0_40] : memref<2x2x32xf32, #tpu.memory_space<vmem>>, vector<1x2x32xf32>
    %87 = vector.shape_cast %86 : vector<1x2x32xf32> to vector<2x32xf32>
    %88 = vector.shape_cast %80 : vector<2x32xf32> to vector<1x2x32xf32>
    tpu.vector_store %arg12[%c1_38, %c0_39, %c0_40], %88 {strides = array<i32>} : memref<2x2x32xf32, #tpu.memory_space<vmem>>, vector<1x2x32xf32>,
    %c0_41 = arith.constant 0 : index
    %c0_42 = arith.constant 0 : index
    %89 = vector.load %arg8[%c0_41, %c0_42] : memref<32x16xf32, #tpu.memory_space<vmem>>, vector<32x16xf32>
    %cst_43 = arith.constant dense<0.000000e+00> : vector<2x16xf32>
    %90 = tpu.matmul %82, %89, %cst_43 {dimension_numbers = #tpu.dot_dimension_numbers<[1], [0], [0], [1], [0, 0, 1, 1], [], []>} : vector<2x32xf32>, vector<32x16xf32>, vector<2x16xf32> -> vector<2x16xf32>
    %c0_44 = arith.constant 0 : index
    %c0_45 = arith.constant 0 : index
    %91 = vector.load %arg9[%c0_44, %c0_45] : memref<1x16xf32, #tpu.memory_space<vmem>>, vector<1x16xf32>
    %92 = vector.broadcast %91 : vector<1x16xf32> to vector<2x16xf32>
    %93 = arith.addf %90, %92 : vector<2x16xf32>
    %c0_46 = arith.constant 0 : index
    %c0_47 = arith.constant 0 : index
    %94 = vector.load %arg10[%c0_46, %c0_47] : memref<2x16xf32, #tpu.memory_space<vmem>>, vector<2x16xf32>
    tpu.vector_store %arg10[%c0_46, %c0_47], %93 {strides = array<i32>} : memref<2x16xf32, #tpu.memory_space<vmem>>, vector<2x16xf32>,
    return
  }
}

</mosaic_0001>

<bundles_post_ra>
// kernel: _lambda_.1
= control target key start
LH: loop header
LB: loop body
LE: loop exit
PB: predicated region body
PF: predicated region fallthrough
CT: control target
= control target key end

     0   :  { %18 = vsyncpa [#allocation5], 0  ;;  %s803_s0 = inlined_call_operand.vmem [shape: s32[2], index: 0, kind: input, shape index: {}]   ;;  %s804_s1 = inlined_call_operand.vmem [shape: f32[16,32], index: 1, kind: input, shape index: {}]   ;;  %s805_s2 = inlined_call_operand.hbm [shape: f32[2,2,32], index: 2, kind: input, shape index: {}, may-alias: {2,11}]   ;;  %s806_s3 = inlined_call_operand.hbm [shape: f32[2,2,32], index: 3, kind: input, shape index: {}, may-alias: {3,12}]   ;;  %s807_s4 = inlined_call_operand.hbm [shape: f32[64,128], index: 4, kind: input, shape index: {}]   ;;  %s808_s5 = inlined_call_operand.vmem [shape: f32[1,128], index: 5, kind: input, shape index: {}]   ;;  %s809_s6 = inlined_call_operand.hbm [shape: f32[64,128], index: 6, kind: input, shape index: {}]   ;;  %s810_s7 = inlined_call_operand.vmem [shape: f32[1,128], index: 7, kind: input, shape index: {}]   ;;  %s811_s8 = inlined_call_operand.vmem [shape: f32[32,16], index: 8, kind: input, shape index: {}]   ;;  %s812_s9 = inlined_call_operand.vmem [shape: f32[1,16], index: 9, kind: input, shape index: {}]   ;;  %s813_s10 = inlined_call_operand.hbm [shape: f32[2,16], index: 10, kind: output, shape index: {0}]   ;;  %s814_s11 = inlined_call_operand.hbm [shape: f32[2,2,32], index: 11, kind: output, shape index: {1}, may-alias: {2,11}]   ;;  %s815_s12 = inlined_call_operand.hbm [shape: f32[2,2,32], index: 12, kind: output, shape index: {2}, may-alias: {3,12}]  }
   0x1   :  { %19 = vsyncpa [#allocation3], 0 }
   0x2   :  { %20 = vsyncpa [#allocation8], 0 }
   0x3   :  { %21 = vsyncpa [#allocation11], 0 }
   0x4   :  { %22 = vsyncpa [#allocation4], 0 }
   0x5   :  { %23 = vsyncpa [#allocation14], 0  ;;  %s52_s23 = sshll.u32 %s806_s3, 4  ;;  %s640_s24 = smov [#allocation7]   ;;  %s53_s23 = int_to_ptr.hbm [resolvable:$true] %s52_s23 }
   0x6   :  { %s54_s25 = sshll.u32 %s640_s24, 4  ;;  %s29_s28 = sshll.u32 %s803_s0, 4  ;;  %s55_s25 = int_to_ptr.vmem [resolvable:$true] %s54_s25  ;;  %s30_s28 = int_to_ptr.vmem [resolvable:$true] %s29_s28 }
   0x7   :  { %s641_s29 = smov 32   ;;  %s642_s30 = smov 2  }
   0x8   :  { %60 = dma.hbm_to_vmem [thread:$0]  %s53_s23, 64, %s55_s25, [#allocation8], %s641_s29, %s641_s29, %s642_s30  }
   0x9   :  { %s643_s13 = smov [#allocation2]   ;;  %s39_s3 = sshll.u32 %s805_s2, 4  ;;  %s40_s3 = int_to_ptr.hbm [resolvable:$true] %s39_s3 }
   0xa   :  { %32 = dma.vmem_to_smem %s30_s28, 16, %s643_s13, [#allocation5]  }
   0xb   :  { %s644_s16 = smov [#allocation6]   ;;  %s65_s0 = sshll.u32 %s807_s4, 4  ;;  %s66_s0 = int_to_ptr.hbm [resolvable:$true] %s65_s0 }
   0xc   :  { %s41_s17 = sshll.u32 %s644_s16, 4  ;;  %s645_s20 = smov [#allocation9]   ;;  %s42_s17 = int_to_ptr.vmem [resolvable:$true] %s41_s17 }
   0xd   :  { %47 = dma.hbm_to_vmem [thread:$0]  %s40_s3, 64, %s42_s17, [#allocation3], %s641_s29, %s641_s29, %s642_s30  }
   0xe   :  { %s67_s21 = sshll.u32 %s645_s20, 4  ;;  %s646_s22 = smov 128   ;;  %s68_s21 = int_to_ptr.vmem [resolvable:$true] %s67_s21 }
   0xf   :  { %s647_s23 = smov 8   ;;  %s80_s25 = sshll.u32 %s809_s6, 4  ;;  %s81_s25 = int_to_ptr.hbm [resolvable:$true] %s80_s25 }
  0x10   :  { %73 = dma.hbm_to_vmem [thread:$0]  %s66_s0, 1024, %s68_s21, [#allocation8], %s646_s22, %s646_s22, %s647_s23  }
  0x11   :  { %s648_s26 = smov [#allocation10]  }
  0x12   :  { %s82_s27 = sshll.u32 %s648_s26, 4  ;;  %s83_s27 = int_to_ptr.vmem [resolvable:$true] %s82_s27 }
  0x13   :  { %88 = dma.hbm_to_vmem [thread:$0]  %s81_s25, 1024, %s83_s27, [#allocation11], %s646_s22, %s646_s22, %s647_s23  }
  0x14   :  { %628 = dma.done.wait [#allocation5], 16  }
  0x15   :  { %629 = vsyncadd [#allocation5], 4294967280 }
  0x16   :  { %630 = dma.done.wait [#allocation3], 64  }
  0x17   :  { %631 = vsyncadd [#allocation3], 4294967232 }
  0x18   :  { %632 = dma.done.wait [#allocation8], 1088  }
  0x19   :  { %633 = vsyncadd [#allocation8], 4294966208 }
  0x1a   :  { %634 = dma.done.wait [#allocation11], 1024  }
  0x1b   :  { %635 = vsyncadd [#allocation11], 4294966272 }
  0x1c   :  { %115 = sfence }
  0x1d   :  { %v127_v0 = vld [vmem:[#allocation6] sm:$0x3]  ;;  %v141_v2 = vld [vmem:[#allocation9 + $0x30] sm:$0xff]  ;;  %v140_v3 = vld [vmem:[#allocation9 + $0x28] sm:$0xff]  ;;  %s409_s4 = sld [smem:[#allocation2 + $0x1]]  ;;  %vm125_vm0 = vcmask 1040384  }
  0x1e   :  { %v142_v1 = vld [vmem:[#allocation9 + $0x38] sm:$0xff]  ;;  %130 = vrot.lane.b32.xlu0 %v127_v0, %s641_s29  ;;  %v139_v4 = vld [vmem:[#allocation9 + $0x20] sm:$0xff]  ;;  %v137_v6 = vld [vmem:[#allocation9 + $0x10] sm:$0xff]  ;;  %s116_s6 = sld [smem:[#allocation2]]  ;;  %vm133_vm1 = vcmask 261120   ;;  %vm147_vm2 = vcmask 523264  }
  0x1f   :  { %159 = vmatpush.msra.mxu0 %v142_v1  ;;  %v138_v5 = vld [vmem:[#allocation9 + $0x18] sm:$0xff]  ;;  %v136_v7 = vld [vmem:[#allocation9 + $0x8] sm:$0xff]  ;;  %v135_v8 = vld [vmem:[#allocation9] sm:$0xff]  ;;  %vm216_vm7 = vcmask 254976   ;;  %s651_s26 = smov [#allocation13]   ;;  %s652_s28 = smov [#allocation15]  }
  0x20   :  { %v128_v9 = vld [vmem:[#allocation7] sm:$0x3]  ;;  %v429_v16 = vld [vmem:[%s808_s5] ss:$0 sm:$0xff]  ;;  %v224_v35 = vld [vmem:[#allocation6 + $0x2] sm:$0x3] }
  0x21   :  { %160 = vmatpush.msra.mxu0 %v141_v2  ;;  %192 = vrot.lane.b32.xlu1 %v128_v9, %s641_s29  ;;  %v239_v41 = vld [vmem:[#allocation10 + $0x38] sm:$0xff]  ;;  %v238_v42 = vld [vmem:[#allocation10 + $0x30] sm:$0xff]  ;;  %v237_v43 = vld [vmem:[#allocation10 + $0x28] sm:$0xff]  ;;  %s367_s27 = sshll.u32 %s651_s26, 4  ;;  %s380_s13 = sshll.u32 %s652_s28, 4  ;;  %vm350_vm12 = vcmask 123904   ;;  %s368_s27 = int_to_ptr.vmem [resolvable:$true] %s367_s27  ;;  %s381_s13 = int_to_ptr.vmem [resolvable:$true] %s380_s13 }
  0x22   :  { %255 = vmatpush.msra.mxu1 %v239_v41  ;;  %v236_v44 = vld [vmem:[#allocation10 + $0x20] sm:$0xff]  ;;  %v235_v45 = vld [vmem:[#allocation10 + $0x18] sm:$0xff]  ;;  %v234_v46 = vld [vmem:[#allocation10 + $0x10] sm:$0xff]  ;;  %s382_s3 = sshll.u32 %s815_s12, 4  ;;  %s653_s17 = smov [#allocation12]   ;;  %s383_s3 = int_to_ptr.hbm [resolvable:$true] %s382_s3 }
  0x23   :  { %161 = vmatpush.msra.mxu0 %v140_v3  ;;  %s120_s14 = scalar_lea.vmem %s804_s1, %s409_s4  ;;  %v233_v47 = vld [vmem:[#allocation10 + $0x8] sm:$0xff]  ;;  %v232_v50 = vld [vmem:[#allocation10] sm:$0xff]  ;;  %v226_v51 = vld [vmem:[#allocation7 + $0x2] sm:$0x3]  ;;  %s357_s18 = sshll.u32 %s653_s17, 4  ;;  %s358_s18 = int_to_ptr.vmem [resolvable:$true] %s357_s18 }
  0x24   :  { %v121_v10 = vld [vmem:[%s120_s14] sm:$0x1]  ;;  %s117_s16 = scalar_lea.vmem %s804_s1, %s116_s6  ;;  %s649_s1 = smov 64   ;;  %256 = vmatpush.msra.mxu1 %v238_v42 }
  0x25   :  { %162 = vmatpush.msra.mxu0 %v139_v4  ;;  %v123_v11 = vrot.slane %v121_v10, 7  ;;  %v118_v12 = vld [vmem:[%s117_s16] sm:$0x1]  ;;  %s359_s19 = sshll.u32 %s813_s10, 4  ;;  %s360_s19 = int_to_ptr.hbm [resolvable:$true] %s359_s19 }
  0x26   :  { %257 = vmatpush.msra.mxu1 %v237_v43  ;;  %v430_v55 = vld [vmem:[%s810_s7] ss:$0 sm:$0xff]  ;;  %s650_s7 = smov 96  }
  0x27   :  { %163 = vmatpush.msra.mxu0 %v138_v5  ;;  %v126_v13 = vsel %vm125_vm0, %v118_v12, %v123_v11 }
  0x28   :  { %258 = vmatpush.msra.mxu1 %v236_v44 }
  0x29   :  { %164 = vmatpush.msra.mxu0 %v137_v6 }
  0x2a   :  { %259 = vmatpush.msra.mxu1 %v235_v45 }
  0x2b   :  { %165 = vmatpush.msra.mxu0 %v136_v7 }
  0x2c   :  { %260 = vmatpush.msra.mxu1 %v234_v46 }
  0x2d   :  { %166 = vmatpush.msra.mxu0 %v135_v8 }
  0x2e   :  { %261 = vmatpush.msra.mxu1 %v233_v47 }
  0x30   :  { %262 = vmatpush.msra.mxu1 %v232_v50 }
  0x90   :  { %v131_v14 = vpop.permute.xlu0 %130 }
  0x91   :  { %v134_v15 = vsel %vm133_vm1, %v126_v13, %v131_v14 }
  0x92   :  { %410 = vmatmul.msk.f32.vlgmr.msra.gmra.mxu0 %vm147_vm2, %v134_v15 }
  0x93   :  { %v193_v36 = vpop.permute.xlu1 %192 }
 0x10f   :  { %v168_v17 = vpop.f32.mrf.mxu0 }
 0x110   :  { %v169_v18 = vadd.f32 %v429_v16, %v168_v17  ;;  %v323_v16 = vld [vmem:[%s811_s8 + $0x18] sm:$0xff]  ;;  %v322_v17 = vld [vmem:[%s811_s8 + $0x10] sm:$0xff] }
 0x111   :  { %342 = vmatpush.msra.mxu2 %v323_v16 }
 0x112   :  { %432 = vtanh.f32 %v169_v18  ;;  %v411_v20 = vmul.f32 -1.442695, %v169_v18  ;;  %v321_v18 = vld [vmem:[%s811_s8 + $0x8] sm:$0xff] }
 0x113   :  { %343 = vmatpush.msra.mxu2 %v322_v17 }
 0x114   :  { %434 = vpow2.f32 %v411_v20 }
 0x115   :  { %344 = vmatpush.msra.mxu2 %v321_v18 }
 0x118   :  { %v433_v19 = vpop.eup %432 }
 0x119   :  { %197 = vrot.lane.b32.xlu0 %v433_v19, %s649_s1  ;;  %v320_v19 = vld [vmem:[%s811_s8] sm:$0xff]  ;;  %s369_s8 = sshll.u32 %s814_s11, 4  ;;  %s370_s8 = int_to_ptr.hbm [resolvable:$true] %s369_s8 }
 0x11a   :  { %v435_v21 = vpop.eup %434  ;;  %345 = vmatpush.msra.mxu2 %v320_v19 }
 0x11b   :  { %v174_v22 = vadd.f32 1.0, %v435_v21 }
 0x11d   :  { %436 = vrcp.f32 %v174_v22  ;;  %v186_v28 = vand.u32 2147483648, %v174_v22  ;;  %vm180_vm4 = vweird.f32 %v174_v22  ;;  %v184_v29 = vand.u32 2147483647, %v174_v22 }
 0x11f   :  { %v187_v31 = vor.u32 1.1754944e-38, %v186_v28  ;;  %vm185_vm6 = vcmp.eq.f32.partialorder %v184_v29, 8.507059e+37 }
 0x121   :  { %228 = vrot.lane.b32.xlu0 %v224_v35, %s641_s29 }
 0x123   :  { %v437_v23 = vpop.eup %436 }
 0x124   :  { %v176_v24 = vmul.f32 %v437_v23, %v174_v22  ;;  %vm181_vm3 = vweird.f32 %v437_v23 }
 0x125   :  { %vm182_vm5 = vmor %vm180_vm4, %vm181_vm3 }
 0x126   :  { %v177_v25 = vsub.f32 1.0, %v176_v24  ;;  %v431_v24 = vld [vmem:[%s812_s9] ss:$0 sm:$0xff] }
 0x128   :  { %v178_v26 = vmul.f32 %v437_v23, %v177_v25 }
 0x12a   :  { %v179_v27 = vadd.f32 %v437_v23, %v178_v26 }
 0x12c   :  { %v183_v30 = vsel %vm182_vm5, %v437_v23, %v179_v27 }
 0x12d   :  { %v188_v32 = vsel %vm185_vm6, %v187_v31, %v183_v30 }
 0x12e   :  { %v195_v37 = vmul.f32 %v193_v36, %v188_v32 }
 0x18b   :  { %v198_v33 = vpop.permute.xlu0 %197 }
 0x18c   :  { %v200_v34 = vmul.f32 %v198_v33, %v188_v32 }
 0x18e   :  { %202 = vrot.lane.b32.xlu1 %v200_v34, %s641_s29 }
 0x193   :  { %v229_v52 = vpop.permute.xlu0 %228 }
 0x200   :  { %v203_v38 = vpop.permute.xlu1 %202 }
 0x201   :  { %v205_v39 = vadd.f32 %v203_v38, %v195_v37 }
 0x203   :  { %438 = vtanh.f32 %v205_v39 }
 0x209   :  { %v439_v40 = vpop.eup %438 }
 0x20a   :  { %208 = vrot.lane.b32.xlu2 %v439_v40, %s649_s1 }
 0x264   :  { %v209_v48 = vpop.permute.xlu2 %208 }
 0x265   :  { %v211_v49 = vmul.f32 %v209_v48, %v188_v32 }
 0x267   :  { %213 = vrot.lane.b32.xlu2 %v211_v49, %s641_s29 }
 0x26f   :  { %288 = vrot.lane.b32.xlu2 %v226_v51, %s641_s29 }
 0x2c1   :  { %v214_v53 = vpop.permute.xlu2 %213 }
 0x2c2   :  { %217 = vst.msk [vmem:[#allocation13] sm:$0x3] %vm216_vm7, %v214_v53  ;;  %v231_v54 = vsel %vm133_vm1, %v214_v53, %v229_v52 }
 0x2c3   :  { %412 = vmatmul.msk.f32.vlgmr.msra.gmra.mxu1 %vm147_vm2, %v231_v54 }
 0x2c9   :  { %v289_v10 = vpop.permute.xlu2 %288 }
 0x340   :  { %v264_v56 = vpop.f32.mrf.mxu1 }
 0x341   :  { %v265_v57 = vadd.f32 %v430_v55, %v264_v56 }
 0x343   :  { %440 = vtanh.f32 %v265_v57  ;;  %v413_v59 = vmul.f32 -1.442695, %v265_v57 }
 0x345   :  { %442 = vpow2.f32 %v413_v59 }
 0x349   :  { %v441_v58 = vpop.eup %440 }
 0x34a   :  { %293 = vrot.lane.b32.xlu1 %v441_v58, %s649_s1 }
 0x34b   :  { %v443_v60 = vpop.eup %442 }
 0x34c   :  { %v270_v61 = vadd.f32 1.0, %v443_v60 }
 0x34e   :  { %444 = vrcp.f32 %v270_v61  ;;  %v282_v3 = vand.u32 2147483648, %v270_v61  ;;  %vm276_vm9 = vweird.f32 %v270_v61  ;;  %v280_v4 = vand.u32 2147483647, %v270_v61 }
 0x350   :  { %v283_v6 = vor.u32 1.1754944e-38, %v282_v3  ;;  %vm281_vm11 = vcmp.eq.f32.partialorder %v280_v4, 8.507059e+37 }
 0x354   :  { %v445_v62 = vpop.eup %444 }
 0x355   :  { %v272_v63 = vmul.f32 %v445_v62, %v270_v61  ;;  %vm277_vm8 = vweird.f32 %v445_v62 }
 0x356   :  { %vm278_vm10 = vmor %vm276_vm9, %vm277_vm8 }
 0x357   :  { %v273_v0 = vsub.f32 1.0, %v272_v63 }
 0x359   :  { %v274_v1 = vmul.f32 %v445_v62, %v273_v0 }
 0x35b   :  { %v275_v2 = vadd.f32 %v445_v62, %v274_v1 }
 0x35d   :  { %v279_v5 = vsel %vm278_vm10, %v445_v62, %v275_v2 }
 0x35e   :  { %v284_v7 = vsel %vm281_vm11, %v283_v6, %v279_v5 }
 0x35f   :  { %v291_v11 = vmul.f32 %v289_v10, %v284_v7 }
 0x3bc   :  { %v294_v8 = vpop.permute.xlu1 %293 }
 0x3bd   :  { %v296_v9 = vmul.f32 %v294_v8, %v284_v7 }
 0x3bf   :  { %298 = vrot.lane.b32.xlu0 %v296_v9, %s641_s29 }
 0x3c7   :  { %219 = vrot.lane.b32.xlu0 %v205_v39, %s650_s7 }
 0x431   :  { %v299_v12 = vpop.permute.xlu0 %298 }
 0x432   :  { %v301_v13 = vadd.f32 %v299_v12, %v291_v11 }
 0x434   :  { %446 = vtanh.f32 %v301_v13 }
 0x439   :  { %v220_v14 = vpop.permute.xlu0 %219 }
 0x43a   :  { %v447_v15 = vpop.eup %446  ;;  %222 = vst.msk [vmem:[#allocation15] sm:$0x3] %vm216_vm7, %v220_v14 }
 0x43b   :  { %304 = vrot.lane.b32.xlu1 %v447_v15, %s649_s1 }
 0x443   :  { %315 = vrot.lane.b32.xlu1 %v301_v13, %s650_s7 }
 0x4ad   :  { %v305_v20 = vpop.permute.xlu1 %304 }
 0x4ae   :  { %v307_v21 = vmul.f32 %v305_v20, %v284_v7 }
 0x4b0   :  { %309 = vrot.lane.b32.xlu2 %v307_v21, %s641_s29 }
 0x4b5   :  { %v316_v22 = vpop.permute.xlu1 %315 }
 0x4b6   :  { %319 = vst.msk [vmem:[#allocation15 + $0x2] sm:$0x3] %vm216_vm7, %v316_v22 }
 0x50a   :  { %v310_v23 = vpop.permute.xlu2 %309 }
 0x50b   :  { %313 = vst.msk [vmem:[#allocation13 + $0x2] sm:$0x3] %vm216_vm7, %v310_v23  ;;  %414 = vmatmul.msk.f32.vlgmr.msra.gmra.mxu2 %vm133_vm1, %v310_v23 }
 0x50c   :  { %375 = dma.vmem_to_hbm [thread:$0]  %s368_s27, 64, %s370_s8, [#allocation14], %s641_s29, %s641_s29, %s642_s30  }
 0x50d   :  { %388 = dma.vmem_to_hbm [thread:$0]  %s381_s13, 64, %s383_s3, [#allocation14], %s641_s29, %s641_s29, %s642_s30  }
 0x58e   :  { %v347_v25 = vpop.f32.mrf.mxu2 }
 0x58f   :  { %v348_v26 = vadd.f32 %v431_v24, %v347_v25 }
 0x591   :  { %351 = vst.msk [vmem:[#allocation12] sm:$0x3] %vm350_vm12, %v348_v26 }
 0x592   :  { %362 = dma.vmem_to_hbm [thread:$0]  %s358_s18, 32, %s360_s19, [#allocation4]  }
 0x593   :  { %636 = dma.done.wait [#allocation4], 32  }
 0x594   :  { %637 = vsyncadd [#allocation4], 4294967264 }
 0x595   :  { %638 = dma.done.wait [#allocation14], 128  }
 0x596   :  { %639 = vsyncadd [#allocation14], 4294967168 }
 0x597   :  { %401 = vsyncpa [#allocation3], 1 }
 0x598   :  { %402 = vsyncpa [#allocation8], 1 }
 0x599   :  { %403 = vsyncpa [#allocation11], 1 }
 0x59a   :  { %404 = vsyncpa [#allocation4], 1 }
 0x59b   :  { %405 = vsyncpa [#allocation14], 1 }
 0x59c   :  { %406 = vsyncpa [#allocation5], 1 }

</bundles_post_ra>
